<compile_context>
chip_gen: v5e
topology: v5e:2x2
jax: 0.10.0
libtpu: 0.0.40
codegen_flags: <defaults>
</compile_context>

<pallas_src>
import jax
import jax.numpy as jnp
from jax.experimental import pallas as pl
from jax.experimental.pallas import tpu as pltpu


def _gcn_kernel(x_ref, adj_ref, w_ref, b2_ref, o_ref, h1_ref, acc_ref):
    # x_ref:   (TB, N, C_in)   bf16  -- constant over k (DMA'd once per b tile)
    # adj_ref: (TB, N, TK)     bf16  -- neighbor (contraction) tile k
    # w_ref:   (C_in, 2*C_out) bf16  -- fused [W1^T | W2^T], constant over grid
    # b2_ref:  (1, C_out)      f32   -- 2 * bias, constant over grid
    # o_ref:   (TB, N, C_out)        -- written once at the last k step
    # h1_ref:  (TB, N, C_out)  bf16  -- cached lin1 projection (scratch)
    # acc_ref: (TB, N, C_out)  f32   -- aggregation accumulator (scratch)
    k = pl.program_id(1)
    TB, N, C_in = x_ref.shape
    C_out = o_ref.shape[-1]
    TK = adj_ref.shape[-1]

    @pl.when(k == 0)
    def _init():
        # Fused lin1/lin2 projection: one MXU dot over all TB*N rows.
        x2d = x_ref[...].reshape(TB * N, C_in)
        proj = jnp.dot(x2d, w_ref[...], preferred_element_type=jnp.float32)
        h1_ref[...] = proj[:, :C_out].reshape(TB, N, C_out).astype(h1_ref.dtype)
        # NOTE: the 2*bias fold (adj@h1 + h2 + 2*bias) is only valid for the
        # mask=None path of the reference module.
        acc_ref[...] = proj[:, C_out:].reshape(TB, N, C_out) + b2_ref[...]

    # Neighborhood aggregation for this neighbor tile:
    #   acc[b, n, c] += sum_m adj[b, n, m0+m] * h1[b, m0+m, c]
    # (bf16 operands, f32 accumulation on the MXU.)
    m0 = pl.multiple_of(k * TK, TK)
    h1_blk = h1_ref[:, pl.ds(m0, TK), :]
    acc_ref[...] += jnp.einsum(
        "bnm,bmc->bnc", adj_ref[...], h1_blk,
        preferred_element_type=jnp.float32,
    )

    @pl.when(k == pl.num_programs(1) - 1)
    def _finalize():
        o_ref[...] = acc_ref[...].astype(o_ref.dtype)


def _vmem_capacity_bytes():
    # Per-TensorCore VMEM capacity. Fallback = 64 MiB (v7x per-TC, the
    # smallest across v5e/v6e/v7x) so the tile budget is safe everywhere.
    try:
        return int(pltpu.get_tpu_info().vmem_capacity_bytes)
    except Exception:
        return 64 * 1024 * 1024


def _select_tiles(B, N, C_in, C_out, out_itemsize, block_b, budget_bytes):
    """Pick (TB, TK): TB divides B (no host-side padding); TK is a multiple of
    128 dividing N (or N itself, per the (8,128) block rule). Both are sized
    against an explicit per-step VMEM byte budget."""
    if N % 128 == 0:
        tk_cands = [t for t in range(N, 0, -128) if N % t == 0]
    else:
        tk_cands = [N]

    bf16, f32, dbl = 2, 4, 2   # dbl: pallas double-buffers pipelined operands

    def est(tb, tk):
        return (dbl * tb * N * C_in * bf16             # x tile
                + dbl * tb * N * tk * bf16             # adj tile (dominant)
                + dbl * C_in * 2 * C_out * bf16        # fused weight
                + dbl * 8 * 128 * f32                  # 2*bias (tile-padded)
                + dbl * tb * N * C_out * out_itemsize  # out tile
                + tb * N * C_out * bf16                # h1 scratch
                + tb * N * C_out * f32)                # f32 accumulator scratch

    divisors = [d for d in range(B, 0, -1) if B % d == 0]
    if block_b is not None and 1 <= block_b <= B and B % block_b == 0:
        tb_cands = [block_b] + [d for d in divisors if d < block_b]
    else:
        tb_cands = divisors

    for tb in tb_cands:
        for tk in tk_cands:
            if est(tb, tk) <= budget_bytes:
                return tb, tk
    # Smallest tiles even if over budget (still correct; only reachable for
    # huge N that is not a multiple of 128).
    return 1, tk_cands[-1]


def gcn_forward(x, adj, w1, w2, bias, *, block_b=None):
    """GCN forward (mask=None path).

    x:     (B, N, C_in) or (N, C_in)
    adj:   (B, N, N)    or (N, N)
    w1/w2: (C_out, C_in)  (PyTorch nn.Linear weight layout, bias-free linears)
    bias:  (C_out,)
    block_b: optional batch-tile size; must divide B (no padding). Default is
      auto (largest divisor of B fitting the VMEM budget). On v7x pass e.g.
      B // 2 so each TensorCore gets one balanced tile.
    """
    # TODO(synk): optional `mask` argument (out * mask before the lin2 add) is
    # not implemented; this is the mask=None path and the 2*bias fold in the
    # kernel assumes it.
    squeeze = x.ndim == 2
    if x.ndim == 2:
        x = x[None]
    if adj.ndim == 2:
        adj = adj[None]
    B, N, C_in = x.shape
    C_out = w1.shape[0]
    out_dtype = x.dtype

    # Layout preconditions so the in-kernel reshapes / lane slices are
    # copy-free (sublane tile = 8, lane tile = 128).
    assert N % 8 == 0, f"N={N} must be a multiple of 8 for this kernel"
    assert C_out % 128 == 0, f"C_out={C_out} must be a multiple of 128"

    # bf16 MXU inputs, f32 accumulation.
    x_bf = x.astype(jnp.bfloat16)
    adj_bf = adj.astype(jnp.bfloat16)
    # Fuse the two projections into one (C_in, 2*C_out) weight; fold both bias
    # adds into a single 2*bias term added once.
    w_fused = jnp.concatenate(
        [jnp.asarray(w1).T, jnp.asarray(w2).T], axis=1
    ).astype(jnp.bfloat16)
    b2 = (2.0 * jnp.asarray(bias, jnp.float32)).reshape(1, C_out)

    # Budget the tiles against per-core VMEM and set the scoped limit.
    vmem_cap = _vmem_capacity_bytes()
    TB, TK = _select_tiles(
        B, N, C_in, C_out, jnp.dtype(out_dtype).itemsize, block_b,
        budget_bytes=vmem_cap // 2,
    )
    vmem_limit = min(vmem_cap * 3 // 4, 128 * 1024 * 1024)

    grid = (B // TB, N // TK)

    out = pl.pallas_call(
        _gcn_kernel,
        out_shape=jax.ShapeDtypeStruct((B, N, C_out), out_dtype),
        grid_spec=pltpu.PrefetchScalarGridSpec(
            num_scalar_prefetch=0,
            grid=grid,
            in_specs=[
                # x: constant over k -> DMA'd once per batch tile.
                pl.BlockSpec((TB, N, C_in), lambda b, k: (b, 0, 0)),
                # adj: tiled along the neighbor (contraction) axis.
                pl.BlockSpec((TB, N, TK), lambda b, k: (b, 0, k)),
                # Fused weight / 2*bias: constant index -> DMA'd once for the
                # whole grid. (Single-buffering them would save a further
                # ~2*C_in*2*C_out bytes of VMEM; left double-buffered for
                # portability.)
                pl.BlockSpec((C_in, 2 * C_out), lambda b, k: (0, 0)),
                pl.BlockSpec((1, C_out), lambda b, k: (0, 0)),
            ],
            out_specs=pl.BlockSpec((TB, N, C_out), lambda b, k: (b, 0, 0)),
            scratch_shapes=[
                pltpu.VMEM((TB, N, C_out), jnp.bfloat16),   # cached h1
                pltpu.VMEM((TB, N, C_out), jnp.float32),    # f32 accumulator
            ],
        ),
        compiler_params=pltpu.CompilerParams(
            dimension_semantics=("parallel", "arbitrary"),
            vmem_limit_bytes=int(vmem_limit),
        ),
    )(x_bf, adj_bf, w_fused, b2)

    if squeeze:
        out = out[0]
    return out


def _reference(x, adj, w1, w2, bias):
    hp = jax.lax.Precision.HIGHEST
    h1 = jnp.einsum("bnc,oc->bno", x, w1, precision=hp)
    h2 = jnp.einsum("bnc,oc->bno", x, w2, precision=hp)
    out = jnp.einsum("bnm,bmo->bno", adj, h1, precision=hp) + bias
    return out + h2 + bias


if __name__ == "__main__":
    # Small shapes consistent with the module: 6 graphs of 16 nodes.
    B, N = 6, 16
    C_in, C_out = 32, 128

    key = jax.random.PRNGKey(0)
    k_x, k_a, k_w1, k_w2, k_b = jax.random.split(key, 5)

    x = jax.random.normal(k_x, (B, N, C_in), dtype=jnp.float32)
    adj = jax.random.uniform(k_a, (B, N, N), dtype=jnp.float32)
    adj = adj / jnp.sum(adj, axis=-1, keepdims=True)  # row-normalized adjacency

    bound = 1.0 / (C_in ** 0.5)
    w1 = jax.random.uniform(k_w1, (C_out, C_in), minval=-bound, maxval=bound)
    w2 = jax.random.uniform(k_w2, (C_out, C_in), minval=-bound, maxval=bound)
    bias = jax.random.uniform(k_b, (C_out,), minval=-bound, maxval=bound)

    # block_b=3 -> two balanced, pad-free batch tiles: both v7x TensorCores
    # get equal work, and no host-side padding / throwaway compute. On
    # single-TC chips (v5e/v6e) the extra grid step costs only ~0.35us at
    # this demo size.
    out = gcn_forward(x, adj, w1, w2, bias, block_b=3)
    out = jax.block_until_ready(out)

    ref = _reference(x, adj, w1, w2, bias)
    assert out.shape == (B, N, C_out), out.shape
    max_err = float(jnp.max(jnp.abs(out - ref)))
    # bf16 MXU inputs with f32 accumulation: expect ~1e-3 relative error.
    assert jnp.allclose(out, ref, atol=3e-2, rtol=3e-2), max_err

    print("KERNEL_OK")
</pallas_src>

<mosaic_0001>
module attributes {stable_mosaic.version = 11 : i64} {
  func.func @_gcn_kernel(%arg0: i32, %arg1: i32, %arg2: memref<3x16x32xbf16, #tpu.memory_space<vmem>>, %arg3: memref<3x16x16xbf16, #tpu.memory_space<vmem>>, %arg4: memref<32x256xbf16, #tpu.memory_space<vmem>>, %arg5: memref<1x128xf32, #tpu.memory_space<vmem>>, %arg6: memref<3x16x128xf32, #tpu.memory_space<vmem>>, %arg7: memref<3x16x128xbf16, #tpu.memory_space<vmem>>, %arg8: memref<3x16x128xf32, #tpu.memory_space<vmem>>) attributes {dimension_semantics = [#tpu.dimension_semantics<parallel>, #tpu.dimension_semantics<arbitrary>], iteration_bounds = array<i64: 2, 1>, scalar_prefetch = 0 : i64, scratch_operands = 2 : i64, tpu.core_type = #tpu.core_type<tc>, window_params = [{transform_indices = @transform_0, window_bounds = array<i64: 3, 16, 32>}, {transform_indices = @transform_1, window_bounds = array<i64: 3, 16, 16>}, {pipeline_mode = #tpu.pipeline_mode<synchronous>, transform_indices = @transform_2, window_bounds = array<i64: 32, 256>}, {pipeline_mode = #tpu.pipeline_mode<synchronous>, transform_indices = @transform_3, window_bounds = array<i64: 1, 128>}, {transform_indices = @transform_4, window_bounds = array<i64: 3, 16, 128>}]} {
    %c0_i32 = arith.constant 0 : i32
    %0 = arith.cmpi eq, %arg1, %c0_i32 : i32
    %1 = arith.extui %0 : i1 to i32
    %c0_i32_0 = arith.constant 0 : i32
    %2 = arith.cmpi ne, %1, %c0_i32_0 : i32
    scf.if %2 {
      %c0_13 = arith.constant 0 : index
      %c0_14 = arith.constant 0 : index
      %c0_15 = arith.constant 0 : index
      %15 = vector.load %arg2[%c0_13, %c0_14, %c0_15] : memref<3x16x32xbf16, #tpu.memory_space<vmem>>, vector<3x16x32xbf16>
      %16 = vector.shape_cast %15 : vector<3x16x32xbf16> to vector<48x32xbf16>
      %c0_16 = arith.constant 0 : index
      %c0_17 = arith.constant 0 : index
      %17 = vector.load %arg4[%c0_16, %c0_17] : memref<32x256xbf16, #tpu.memory_space<vmem>>, vector<32x256xbf16>
      %cst_18 = arith.constant dense<0.000000e+00> : vector<48x256xf32>
      %18 = tpu.matmul %16, %17, %cst_18 {dimension_numbers = #tpu.dot_dimension_numbers<[1], [0], [0], [1], [0, 0, 1, 1], [], []>} : vector<48x32xbf16>, vector<32x256xbf16>, vector<48x256xf32> -> vector<48x256xf32>
      %19 = vector.extract_strided_slice %18 {offsets = [0, 0], sizes = [48, 128], strides = [1, 1]} : vector<48x256xf32> to vector<48x128xf32>
      %20 = vector.shape_cast %19 : vector<48x128xf32> to vector<3x16x128xf32>
      %21 = arith.truncf %20 : vector<3x16x128xf32> to vector<3x16x128xbf16>
      %c0_19 = arith.constant 0 : index
      %c0_20 = arith.constant 0 : index
      %c0_21 = arith.constant 0 : index
      %22 = vector.load %arg7[%c0_19, %c0_20, %c0_21] : memref<3x16x128xbf16, #tpu.memory_space<vmem>>, vector<3x16x128xbf16>
      tpu.vector_store %arg7[%c0_19, %c0_20, %c0_21], %21 {strides = array<i32>} : memref<3x16x128xbf16, #tpu.memory_space<vmem>>, vector<3x16x128xbf16>,
      %23 = vector.extract_strided_slice %18 {offsets = [0, 128], sizes = [48, 128], strides = [1, 1]} : vector<48x256xf32> to vector<48x128xf32>
      %24 = vector.shape_cast %23 : vector<48x128xf32> to vector<3x16x128xf32>
      %c0_22 = arith.constant 0 : index
      %c0_23 = arith.constant 0 : index
      %25 = vector.load %arg5[%c0_22, %c0_23] : memref<1x128xf32, #tpu.memory_space<vmem>>, vector<1x128xf32>
      %26 = vector.shape_cast %25 : vector<1x128xf32> to vector<1x1x128xf32>
      %27 = vector.broadcast %26 : vector<1x1x128xf32> to vector<3x16x128xf32>
      %28 = arith.addf %24, %27 : vector<3x16x128xf32>
      %c0_24 = arith.constant 0 : index
      %c0_25 = arith.constant 0 : index
      %c0_26 = arith.constant 0 : index
      %29 = vector.load %arg8[%c0_24, %c0_25, %c0_26] : memref<3x16x128xf32, #tpu.memory_space<vmem>>, vector<3x16x128xf32>
      tpu.vector_store %arg8[%c0_24, %c0_25, %c0_26], %28 {strides = array<i32>} : memref<3x16x128xf32, #tpu.memory_space<vmem>>, vector<3x16x128xf32>,
    } else {
    }
    %c16_i32 = arith.constant 16 : i32
    %3 = arith.muli %arg1, %c16_i32 : i32
    %4 = tpu.assume_multiple %3, 16 : i32
    %c0 = arith.constant 0 : index
    %5 = arith.index_cast %4 : i32 to index
    %c0_1 = arith.constant 0 : index
    %6 = vector.load %arg7[%c0, %5, %c0_1] : memref<3x16x128xbf16, #tpu.memory_space<vmem>>, vector<3x16x128xbf16>
    %c0_2 = arith.constant 0 : index
    %c0_3 = arith.constant 0 : index
    %c0_4 = arith.constant 0 : index
    %7 = vector.load %arg8[%c0_2, %c0_3, %c0_4] : memref<3x16x128xf32, #tpu.memory_space<vmem>>, vector<3x16x128xf32>
    %c0_5 = arith.constant 0 : index
    %c0_6 = arith.constant 0 : index
    %c0_7 = arith.constant 0 : index
    %8 = vector.load %arg3[%c0_5, %c0_6, %c0_7] : memref<3x16x16xbf16, #tpu.memory_space<vmem>>, vector<3x16x16xbf16>
    "tpu.trace_start"() <{level = 10 : i32, message = "bnm,bmc->bnc"}> : () -> ()
    %cst = arith.constant dense<0.000000e+00> : vector<3x16x128xf32>
    %9 = tpu.matmul %8, %6, %cst {dimension_numbers = #tpu.dot_dimension_numbers<[2], [1], [1], [2], [0, 0, 0, 1, 1, 2], [0], [0]>} : vector<3x16x16xbf16>, vector<3x16x128xbf16>, vector<3x16x128xf32> -> vector<3x16x128xf32>
    "tpu.trace_stop"() : () -> ()
    %10 = arith.addf %7, %9 : vector<3x16x128xf32>
    %c0_8 = arith.constant 0 : index
    %c0_9 = arith.constant 0 : index
    %c0_10 = arith.constant 0 : index
    %11 = vector.load %arg8[%c0_8, %c0_9, %c0_10] : memref<3x16x128xf32, #tpu.memory_space<vmem>>, vector<3x16x128xf32>
    tpu.vector_store %arg8[%c0_8, %c0_9, %c0_10], %10 {strides = array<i32>} : memref<3x16x128xf32, #tpu.memory_space<vmem>>, vector<3x16x128xf32>,
    %c0_i32_11 = arith.constant 0 : i32
    %12 = arith.cmpi eq, %arg1, %c0_i32_11 : i32
    %13 = arith.extui %12 : i1 to i32
    %c0_i32_12 = arith.constant 0 : i32
    %14 = arith.cmpi ne, %13, %c0_i32_12 : i32
    scf.if %14 {
      %c0_13 = arith.constant 0 : index
      %c0_14 = arith.constant 0 : index
      %c0_15 = arith.constant 0 : index
      %15 = vector.load %arg8[%c0_13, %c0_14, %c0_15] : memref<3x16x128xf32, #tpu.memory_space<vmem>>, vector<3x16x128xf32>
      %c0_16 = arith.constant 0 : index
      %c0_17 = arith.constant 0 : index
      %c0_18 = arith.constant 0 : index
      %16 = vector.load %arg6[%c0_16, %c0_17, %c0_18] : memref<3x16x128xf32, #tpu.memory_space<vmem>>, vector<3x16x128xf32>
      tpu.vector_store %arg6[%c0_16, %c0_17, %c0_18], %15 {strides = array<i32>} : memref<3x16x128xf32, #tpu.memory_space<vmem>>, vector<3x16x128xf32>,
    } else {
    }
    return
  }
  func.func @transform_0(%arg0: i32, %arg1: i32) -> (i32, i32, i32) {
    %c0_i32 = arith.constant 0 : i32
    %c0_i32_0 = arith.constant 0 : i32
    %c0_i32_1 = arith.constant 0 : i32
    return %arg0, %c0_i32, %c0_i32_0 : i32, i32, i32
  }
  func.func @transform_1(%arg0: i32, %arg1: i32) -> (i32, i32, i32) {
    %c0_i32 = arith.constant 0 : i32
    %c0_i32_0 = arith.constant 0 : i32
    return %arg0, %c0_i32, %arg1 : i32, i32, i32
  }
  func.func @transform_2(%arg0: i32, %arg1: i32) -> (i32, i32) {
    %c0_i32 = arith.constant 0 : i32
    %c0_i32_0 = arith.constant 0 : i32
    %c0_i32_1 = arith.constant 0 : i32
    return %c0_i32, %c0_i32_0 : i32, i32
  }
  func.func @transform_3(%arg0: i32, %arg1: i32) -> (i32, i32) {
    %c0_i32 = arith.constant 0 : i32
    %c0_i32_0 = arith.constant 0 : i32
    %c0_i32_1 = arith.constant 0 : i32
    return %c0_i32, %c0_i32_0 : i32, i32
  }
  func.func @transform_4(%arg0: i32, %arg1: i32) -> (i32, i32, i32) {
    %c0_i32 = arith.constant 0 : i32
    %c0_i32_0 = arith.constant 0 : i32
    %c0_i32_1 = arith.constant 0 : i32
    return %arg0, %c0_i32, %c0_i32_0 : i32, i32, i32
  }
}

</mosaic_0001>

<bundles_post_ra>
// kernel: tpu_custom_call.1
= control target key start
LH: loop header
LB: loop body
LE: loop exit
PB: predicated region body
PF: predicated region fallthrough
CT: control target
= control target key end

     0   :  { %s1302_s0 = inlined_call_operand.hbm [shape: bf16[6,16,32], index: 0, kind: input, shape index: {}]   ;;  %s1303_s1 = inlined_call_operand.hbm [shape: bf16[6,16,16], index: 1, kind: input, shape index: {}]   ;;  %s1304_s2 = inlined_call_operand.hbm [shape: bf16[32,256], index: 2, kind: input, shape index: {}]   ;;  %s1305_s3 = inlined_call_operand.vmem [shape: f32[1,128], index: 3, kind: input, shape index: {}]   ;;  %s1306_s4 = inlined_call_operand.hbm [shape: f32[6,16,128], index: 4, kind: output, shape index: {}]  }
   0x1   :  { %1311 = sst [smem:[#allocation20_spill]] %s1304_s2 }
   0x2   :  { %9 = vsyncpa [#allocation5], 0 }
   0x3   :  { %11 = vsyncpa [#allocation5 + $0x1], 0 }
   0x4   :  { %12 = vsyncpa [#allocation8], 0 }
   0x5   :  { %14 = vsyncpa [#allocation8 + $0x1], 0 }
   0x6   :  { %15 = vsyncpa [#allocation6], 0 }
   0x7   :  { %17 = vsyncpa [#allocation6 + $0x1], 0  ;;  %s1119_s15 = smov 0   ;;  %s1121_s16 = smov 0  }
   0x8   :  { %s1123_s17 = smov 0   ;;  %s1125_s18 = smov 0  }
   0x9   :  { %s1127_s19 = smov 0   ;;  %s1129_s20 = smov 0  }
   0xa LB: > { %1312 = sst [smem:[#allocation15_spill]] %s1073_s17  ;;  %s1150_s21 = sadd.s32 4294967295, %s1085_s20   ;;  %s1085_s20 = sphi %s1129_s20, %s23_s20   ;;  %s1081_s19 = sphi %s1127_s19, %s1327_s19   ;;  %s1077_s18 = sphi %s1125_s18, %s1326_s18   ;;  %s1073_s17 = sphi %s1123_s17, %s1325_s17   ;;  %s1069_s16 = sphi %s1121_s16, %s1329_s16   ;;  %s1065_s15 = sphi %s1119_s15, %s1328_s15  }
   0xb   : > { %1313 = sst [smem:[#allocation16_spill]] %s1081_s19  ;;  %s702_s22 = sadd.s32 4294967294, %s1085_s20  }
   0xc   : > { %p55_p0 = scmp.ne.s32.totalorder %s1069_s16, %s1065_s15  ;;  %p56_p1 = scmp.eq.s32.totalorder %s1150_s21, 0 }
   0xd   : > { %p149_p2 = scmp.eq.s32.totalorder %s1150_s21, 1  ;;  %p155_p3 = scmp.eq.s32.totalorder %s702_s22, 1 }
   0xe   : > { %p1159_p4 = por %p56_p1, %p55_p0  ;;  %p703_p5 = scmp.ge.s32.totalorder %s1085_s20, 1 }
   0xf   : > { %p1164_p6 = por %p155_p3, %p55_p0  ;;  %p162_p7 = scmp.lt.s32.totalorder %s1085_s20, 3 }
  0x10   : > { %s1317_s2 = sld [smem:[#allocation20_spill]]  ;;  %s1087_s29 = smov [#allocation9]  }
  0x11   : > { %s1315_s24 = scalar_select %p1164_p6, 1, 0 }
  0x12   : > { %p1172_p8 = pnand %p703_p5, %p162_p7  ;;  %s175_s30 = sshll.u32 %s1087_s29, 4  ;;  %s176_s30 = int_to_ptr.vmem [resolvable:$true] %s175_s30 }
  0x13   : > { %1316 = sst [smem:[#allocation17_spill]] %s1315_s24  ;;  %p705_p11 = scmp.ge.s32.totalorder %s1085_s20, 2 }
  0x14   : > { %p830_p9 = pneg %p1172_p8  ;;  %s1088_s5 = smov 128  }
  0x15   : > { %s1089_s6 = smov 8   ;;  %s35_s7 = sadd.s32 1, %s1081_s19 }
  0x16   : > { %s173_s27 = sshll.u32 %s1317_s2, 4  ;;  %p831_p10 = pnand %p830_p9, %p56_p1  ;;  %s174_s27 = int_to_ptr.hbm [resolvable:$true] %s173_s27 }
  0x17   : > { %p37_p12 = scmp.ge.s32.totalorder %s35_s7, 2  ;;  %s42_s8 = sadd.s32 1, %s1073_s17 }
  0x18   : > { %833 = dma.hbm_to_vmem [thread:$0]  (!%p831_p10), %s174_s27, 512, %s176_s30, [#allocation8], %s1088_s5, %s1088_s5, %s1089_s6  }
  0x19   : > { %p49_p13 = scmp.ne.s32.totalorder %s1073_s17, %s1069_s16  ;;  %p50_p0 = scmp.eq.s32.totalorder %s1085_s20, 0 }
  0x1a   : > { %s1331_s7 = smov (%p37_p12, %s35_s7), 0  ;;  %p846_p7 = scmp.lt.s32.totalorder %s1085_s20, 2 }
  0x1b   : > { %1319 = sst [smem:[#allocation18_spill]] %s1331_s7  ;;  %p51_p3 = por %p50_p0, %p49_p13 }
  0x1c   : > { %p1190_p5 = por %p149_p2, %p49_p13  ;;  %s39_s10 = ssub.s32 %s1081_s19, %s1331_s7 }
  0x1d   : > { %p40_p9 = scmp.eq.s32.totalorder %s39_s10, 0  ;;  %s192_s11 = sand.u32 1, %s1073_s17  }
  0x1e   : > { %s816_s12 = smul.u32 24, %s192_s11  ;;  %p1202_p10 = pnand %p846_p7, %p51_p3 }
  0x1f   : > { %s1199_s13 = scalar_select %p40_p9, %s1073_s17, %s42_s8  }
  0x20   : > { %s811_s14 = smul.u32 24, %s1081_s19  ;;  %s196_s22 = scalar_lea.vmem [#allocation4], %s816_s12 }
  0x21   : > { %1321 = sst [smem:[#allocation19_spill]] %s1199_s13  ;;  %s205_s25 = sshll.u32 %s196_s22, 4  ;;  %s206_s25 = int_to_ptr.vmem [resolvable:$true] %s205_s25 }
  0x22   : > { %s202_s30 = scalar_lea.hbm %s1302_s0, %s811_s14  ;;  %s215_s6 = sand.u32 1, %s1085_s20  }
  0x23   : > { %s203_s5 = sshll.u32 %s202_s30, 4  ;;  %s193_s10 = scalar_lea.sflag [#allocation5], %s192_s11  ;;  %s204_s5 = int_to_ptr.hbm [resolvable:$true] %s203_s5 }
  0x24   : > { %s1090_s8 = smov 64   ;;  %s1091_s2 = smov 4  }
  0x25   : > { %837 = dma.hbm_to_vmem [thread:$0]  (!%p1202_p10), %s204_s5, 384, %s206_s25, %s193_s10, %s1090_s8, %s1090_s8, %s1091_s2  }
  0x26   : > { %s226_s19 = scalar_lea.hbm %s1303_s1, %s811_s14  ;;  %s219_s13 = scalar_lea.vmem [#allocation7], %s816_s12 }
  0x27   : > { %s229_s17 = sshll.u32 %s219_s13, 4  ;;  %s227_s24 = sshll.u32 %s226_s19, 4  ;;  %s230_s17 = int_to_ptr.vmem [resolvable:$true] %s229_s17  ;;  %s228_s24 = int_to_ptr.hbm [resolvable:$true] %s227_s24 }
  0x28   : > { %s216_s27 = scalar_lea.sflag [#allocation8], %s215_s6  ;;  %241 = sbr.rel (%p1172_p8) target bundleno = 387 (0x183), region = 36 }
  0x29   : > { %840 = dma.hbm_to_vmem [thread:$0]  (!%p1202_p10), %s228_s24, 384, %s230_s17, %s216_s27, %s1090_s8, %s1090_s8, %s1091_s2  }
  0x2a   : > { %s1220_s11 = sand.u32 (!%p1172_p8), 1, %s1069_s16  }
  0x2b   : > { %s818_s25 = smul.u32 (!%p1172_p8), 24, %s1220_s11  ;;  %s244_s7 = scalar_lea.sflag (!%p1172_p8), [#allocation5], %s1220_s11 }
  0x2d   : > { %s247_s14 = scalar_lea.vmem [#allocation4], %s818_s25 }
  0x2e   : > { %1048 = dma.done.wait (%p1159_p4), %s244_s7, 384  }
  0x2f   : > { %1050 = vsyncadd (%p1159_p4), %s244_s7, 4294966912  ;;  %s253_s2 = sand.u32 1, %s1150_s21   ;;  %s1229_s19 = scalar_lea.vmem [#allocation7], %s818_s25 }
  0x30   : > { %s254_s17 = scalar_lea.sflag [#allocation8], %s253_s2 }
  0x31   : > { %1052 = dma.done.wait (%p1159_p4), %s254_s17, 384  }
  0x32   : > { %1054 = vsyncadd (%p1159_p4), %s254_s17, 4294966912 }
  0x33   : > { %1056 = dma.done.wait (%p56_p1), [#allocation8], 512  }
  0x34   : > { %1058 = vsyncadd (%p56_p1), [#allocation8], 4294966784  ;;  %v734_v0 = vld [vmem:[#allocation9 + $0x10] sm:$0xf]  ;;  %v787_v1 = vld [vmem:[#allocation9 + $0x14] sm:$0xf0] }
  0x35   : > { %v726_v2 = vld [vmem:[#allocation9] sm:$0xf]  ;;  %v735_v3 = vor.u32 %v787_v1, %v734_v0  ;;  %v785_v4 = vld [vmem:[#allocation9 + $0x4] sm:$0xf0]  ;;  %vm346_vm0 = vcmask 261120   ;;  %vm466_vm1 = vcmask 130048  }
  0x36   : > { %v727_v5 = vor.u32 %v785_v4, %v726_v2  ;;  %v781_v6 = vld [vmem:[%s247_s14] sm:$0xff]  ;;  %v782_v7 = vld [vmem:[%s247_s14 + $0x8] sm:$0xff]  ;;  %v783_v8 = vld [vmem:[%s247_s14 + $0x10] sm:$0xff]  ;;  %s819_s24 = smul.u32 48, %s1220_s11  ;;  %s568_s6 = scalar_lea.sflag [#allocation6], %s1220_s11 }
  0x37   : > { %362 = vmatpush.bf16.msra.mxu0 %v735_v3  ;;  %v786_v9 = vld [vmem:[#allocation9 + $0x14] sm:$0xf]  ;;  %v736_v10 = vld [vmem:[#allocation9 + $0x18] sm:$0xf0]  ;;  %v784_v12 = vld [vmem:[#allocation9 + $0x4] sm:$0xf] }
  0x38   : > { %v739_v11 = vor.u32 %v786_v9, %v736_v10  ;;  %v728_v13 = vld [vmem:[#allocation9 + $0x8] sm:$0xf0]  ;;  %v792_v25 = vld [vmem:[%s1229_s19 + $0x8] sm:$0xff]  ;;  %v793_v29 = vld [vmem:[%s1229_s19 + $0x10] sm:$0xff]  ;;  %s1255_s28 = scalar_lea.vmem [#allocation10], %s819_s24  ;;  %s815_s12 = smul.u32 48, %s1077_s18 }
  0x39   : > { %v731_v14 = vor.u32 %v784_v12, %v728_v13  ;;  %v791_v20 = vld [vmem:[%s1229_s19] sm:$0xff]  ;;  %s581_s30 = sshll.u32 %s1255_s28, 4  ;;  %s1015_s27 = scalar_lea.hbm %s1306_s4, 96  ;;  %s582_s30 = int_to_ptr.vmem [resolvable:$true] %s581_s30 }
  0x3a   : > { %386 = vmatpush.bf16.msra.mxu1 %v739_v11  ;;  %v904_v31 = vld [vmem:[%s1305_s3] ss:$0 sm:$0xff]  ;;  %s580_s29 = scalar_lea.hbm %s1306_s4, %s815_s12 }
  0x3b   : > { %363 = vmatpush.bf16.msra.mxu0 %v727_v5  ;;  %s583_s5 = sshll.u32 %s580_s29, 4  ;;  %s584_s5 = int_to_ptr.hbm [resolvable:$true] %s583_s5 }
  0x3c   : > { %s1009_s10 = sshra.s32 %s584_s5, 4  ;;  %s1010_s10 = int_to_ptr.hbm [resolvable:$true] %s1009_s10 }
  0x3d   : > { %s1011_s18 = scalar_lea.hbm %s1010_s10, 48  ;;  %p1016_p8 = scmp.lt.s32.totalorder %s1010_s10, %s1306_s4 }
  0x3e   : > { %740 = vmatmul.msk.bf16.vlgmr.msra.gmra.mxu0 %vm346_vm0, %v781_v6  ;;  %387 = vmatpush.bf16.msra.mxu1 %v731_v14  ;;  %p1012_p1 = scmp.ne.s32.totalorder %s1010_s10, %s1011_s18  ;;  %p1017_p12 = scmp.lt.s32.totalorder %s1015_s27, %s1011_s18 }
  0x40   : > { %p1013_p2 = pnand %p1012_p1, %p1190_p5  ;;  %p1018_p13 = por %p1017_p12, %p1016_p8 }
  0x41   : > { %743 = vmatmul.msk.bf16.vlgmr.msra.gmra.mxu1 %vm346_vm0, %v781_v6 }
  0x42   : > { %p1014_p4 = pneg %p1013_p2 }
  0x44   : > { %p1019_p0 = pnand %p1018_p13, %p1014_p4 }
  0x4e   : > { %741 = vmatmul.msk.bf16.gmra.mxu0 %vm346_vm0, %v782_v7 }
  0x51   : > { %744 = vmatmul.msk.bf16.gmra.mxu1 %vm346_vm0, %v782_v7 }
  0x5e   : > { %742 = vmatmul.msk.bf16.gmra.mxu0 %vm346_vm0, %v783_v8 }
  0x61   : > { %745 = vmatmul.msk.bf16.gmra.mxu1 %vm346_vm0, %v783_v8 }
  0xbb   : > { %v365_v15 = vpop.f32.mrf.mxu0 }
  0xbe   : > { %v389_v30 = vpop.f32.mrf.mxu1 }
  0xbf   : > { %v420_v33 = vadd.f32 %v904_v31, %v389_v30 }
  0xc3   : > { %v367_v16 = vpop.f32.mrf.mxu0 }
  0xc4   : > { %v799_v17 = vpack.c.bf16 %v367_v16, %v365_v15 }
  0xc6   : > { %800 = vst [vmem:[#allocation2 + $0x10] sm:$0xff] %v799_v17   ;;  %v391_v32 = vpop.f32.mrf.mxu1 }
  0xc7   : > { %v421_v37 = vadd.f32 %v904_v31, %v391_v32 }
  0xcb   : > { %v370_v18 = vpop.f32.mrf.mxu0 }
  0xcd   : > { %v788_v19 = vld [vmem:[#allocation2 + $0x10] sm:$0xff] }
  0xce   : > { %477 = vmatpush.bf16.msra.mxu2 %v788_v19  ;;  %v394_v36 = vpop.f32.mrf.mxu1 }
  0xcf   : > { %v422_v40 = vadd.f32 %v904_v31, %v394_v36 }
  0xd1   : > { %754 = vmatmul.msk.bf16.vlgmr.msra.gmra.mxu2 %vm466_vm1, %v791_v20 }
  0xd3   : > { %v372_v21 = vpop.f32.mrf.mxu0 }
  0xd4   : > { %v804_v22 = vpack.c.bf16 %v372_v21, %v370_v18 }
  0xd6   : > { %813 = vst [vmem:[#allocation2] sm:$0xff] %v804_v22   ;;  %v396_v42 = vpop.f32.mrf.mxu1 }
  0xd7   : > { %v423_v44 = vadd.f32 %v904_v31, %v396_v42 }
  0xdb   : > { %v375_v23 = vpop.f32.mrf.mxu0 }
  0xdd   : > { %v789_v24 = vld [vmem:[#allocation2] sm:$0xff] }
  0xde   : > { %505 = vmatpush.bf16.msra.mxu3 %v789_v24  ;;  %v399_v47 = vpop.f32.mrf.mxu1 }
  0xdf   : > { %v424_v48 = vadd.f32 %v904_v31, %v399_v47 }
  0xe1   : > { %763 = vmatmul.msk.bf16.vlgmr.msra.gmra.mxu3 %vm466_vm1, %v792_v25 }
  0xe3   : > { %v377_v26 = vpop.f32.mrf.mxu0 }
  0xe4   : > { %v809_v27 = vpack.c.bf16 %v377_v26, %v375_v23 }
  0xe6   : > { %814 = vst [vmem:[#allocation2 + $0x8] sm:$0xff] %v809_v27   ;;  %v401_v51 = vpop.f32.mrf.mxu1 }
  0xe7   : > { %v425_v52 = vadd.f32 %v904_v31, %v401_v51 }
  0xed   : > { %v790_v28 = vld [vmem:[#allocation2 + $0x8] sm:$0xff] }
  0xee   : > { %533 = vmatpush.bf16.msrb.mxu2 %v790_v28 }
  0xf1   : > { %772 = vmatmul.msk.bf16.vlgmr.msrb.gmra.mxu2 %vm466_vm1, %v793_v29 }
 0x154   : > { %v479_v34 = vpop.f32.mrf.mxu2 }
 0x155   : > { %v540_v35 = vadd.f32 %v479_v34, %v420_v33 }
 0x157   : > { %561 = vst [vmem:[%s1255_s28] sm:$0xff] %v540_v35 }
 0x15c   : > { %v481_v38 = vpop.f32.mrf.mxu2 }
 0x15d   : > { %v541_v39 = vadd.f32 %v481_v38, %v421_v37 }
 0x15f   : > { %562 = vst [vmem:[%s1255_s28 + $0x8] sm:$0xff] %v541_v39 }
 0x164   : > { %v507_v41 = vpop.f32.mrf.mxu3 }
 0x165   : > { %v542_v43 = vadd.f32 %v507_v41, %v422_v40 }
 0x167   : > { %563 = vst [vmem:[%s1255_s28 + $0x10] sm:$0xff] %v542_v43 }
 0x16c   : > { %v509_v45 = vpop.f32.mrf.mxu3 }
 0x16d   : > { %v543_v46 = vadd.f32 %v509_v45, %v423_v44 }
 0x16f   : > { %564 = vst [vmem:[%s1255_s28 + $0x18] sm:$0xff] %v543_v46 }
 0x174   : > { %v535_v49 = vpop.f32.mrf.mxu2 }
 0x175   : > { %v544_v50 = vadd.f32 %v535_v49, %v424_v48 }
 0x177   : > { %565 = vst [vmem:[%s1255_s28 + $0x20] sm:$0xff] %v544_v50 }
 0x17c   : > { %v537_v53 = vpop.f32.mrf.mxu2 }
 0x17d   : > { %v545_v54 = vadd.f32 %v537_v53, %v425_v52 }
 0x17f   : > { %566 = vst [vmem:[%s1255_s28 + $0x28] sm:$0xff] %v545_v54 }
 0x180   : > { %1022 = shalt.err (!%p1019_p0)
}
 0x181   : > { %s1092_s11 = smov 128   ;;  %s1093_s14 = smov 8  }
 0x182   : > { %828 = dma.vmem_to_hbm [thread:$0]  (%p1190_p5), %s582_s30, 768, %s584_s5, %s568_s6, %s1092_s11, %s1092_s11, %s1093_s14  }
 0x183 PF: > { %s598_s17 = sand.u32 1, %s1065_s15   ;;  %p842_p3 = pnand %p705_p11, %p1164_p6 }
 0x184   : > { %s599_s19 = scalar_lea.sflag [#allocation6], %s598_s17 }
 0x185   : > { %p843_p7 = pneg %p842_p3 }
 0x187   : > { %1060 = dma.done.wait (%p843_p7), %s599_s19, 768  }
 0x188   : > { %1062 = vsyncadd (%p843_p7), %s599_s19, 4294966528  ;;  %s23_s20 = sadd.s32 1, %s1085_s20   ;;  %s1324_s21 = sld [smem:[#allocation15_spill]] }
 0x189   : > { %p20_p9 = scmp.ge.s32.totalorder %s23_s20, 4   ;;  %s1325_s17 = sld [smem:[#allocation19_spill]] }
 0x18a   : > { %s1326_s18 = sld [smem:[#allocation16_spill]]  ;;  %s1328_s15 = smov %s1069_s16 }
 0x18b   : > { %s1327_s19 = sld [smem:[#allocation18_spill]]  ;;  %22 = sbr.rel (!%p20_p9) target bundleno = 10 (0xa), region = 107 }
 0x18e   : > { %s1329_s16 = smov %s1324_s21 }
 0x190   :  { %605 = vsyncpa [#allocation5], 1 }
 0x191   :  { %607 = vsyncpa [#allocation5 + $0x1], 1 }
 0x192   :  { %608 = vsyncpa [#allocation8], 1 }
 0x193   :  { %610 = vsyncpa [#allocation8 + $0x1], 1 }
 0x194   :  { %611 = vsyncpa [#allocation6], 1 }
 0x195   :  { %613 = vsyncpa [#allocation6 + $0x1], 1 }

</bundles_post_ra>
